<compile_context>
chip_gen: v6e
topology: v6e:2x2x1
jax: 0.10.0
libtpu: 0.0.40
codegen_flags: <defaults>
</compile_context>

<pallas_src>
import functools

import jax
import jax.numpy as jnp
import numpy as np
from jax.experimental import pallas as pl
from jax.experimental.pallas import tpu as pltpu


def _vdropout_kernel(bits_ref, x_ref, o_ref, *, threshold, inv_keep):
    """bits_ref: (1, T) uint32 per-channel random bits.
    x_ref/o_ref: (D, T) data, channels on lanes, components on sublanes."""
    # One Bernoulli draw per channel: integer compare against a precomputed
    # uint32 threshold (= keep_prob * 2^32).
    keep = bits_ref[...] < jnp.asarray(threshold, dtype=jnp.uint32)  # (1, T) bool
    x = x_ref[...]                                                   # (D, T)
    scaled = x * jnp.asarray(inv_keep, dtype=x.dtype)
    # Broadcast the (1, T) channel mask over the D sublanes.
    o_ref[...] = jnp.where(keep, scaled, jnp.zeros_like(scaled)).astype(o_ref.dtype)


def vdropout(x, drop_rate, key, training=True, max_tile_r=8192):
    """JAX/Pallas equivalent of _VDropout.forward.

    x: [..., D] vector features.  One mask value per index over x.shape[:-1].
    key: jax PRNG key supplying the Bernoulli randomness (replaces torch's
         global RNG state).
    """
    if (not training) or drop_rate == 0.0:
        return x

    keep_prob = 1.0 - drop_rate
    inv_keep = 1.0 / keep_prob
    # uint32 threshold for "keep" (clamped so keep_prob ~ 1.0 can't overflow).
    threshold = min(int(round(keep_prob * (2.0 ** 32))), 2 ** 32 - 1)

    orig_shape = x.shape
    D = orig_shape[-1]
    R = int(np.prod(orig_shape[:-1]))  # number of vector channels

    # Lane-dense layout: (D, R) — channels on lanes, D components on sublanes.
    x2 = jnp.moveaxis(x.reshape(R, D), -1, 0)

    # Pad the channel axis up to a whole number of lane tiles.
    r128 = ((R + 127) // 128) * 128
    tile_r = min(max_tile_r, r128)
    r_pad = ((R + tile_r - 1) // tile_r) * tile_r
    if r_pad != R:
        x2 = jnp.pad(x2, ((0, 0), (0, r_pad - R)))

    # One uint32 of randomness per channel, drawn once in the wrapper
    # (independent across all tiles by construction).
    bits = jax.random.bits(key, (1, r_pad), dtype=jnp.uint32)

    num_tiles = r_pad // tile_r
    itemsize = jnp.dtype(x.dtype).itemsize

    grid_spec = pltpu.PrefetchScalarGridSpec(
        num_scalar_prefetch=0,
        grid=(num_tiles,),
        in_specs=[
            pl.BlockSpec((1, tile_r), lambda i: (0, i)),   # bits
            pl.BlockSpec((D, tile_r), lambda i: (0, i)),   # x
        ],
        out_specs=pl.BlockSpec((D, tile_r), lambda i: (0, i)),
    )

    out = pl.pallas_call(
        functools.partial(_vdropout_kernel, threshold=threshold, inv_keep=inv_keep),
        out_shape=jax.ShapeDtypeStruct((D, r_pad), x.dtype),
        grid_spec=grid_spec,
        compiler_params=pltpu.CompilerParams(
            dimension_semantics=("parallel",)),
        cost_estimate=pl.CostEstimate(
            flops=2 * D * r_pad,
            transcendentals=0,
            bytes_accessed=2 * D * r_pad * itemsize + r_pad * 4,
        ),
    )(bits, x2)

    out = out[:, :R]
    return jnp.moveaxis(out, 0, -1).reshape(orig_shape)


if __name__ == "__main__":
    key = jax.random.PRNGKey(0)
    data_key, drop_key = jax.random.split(key)

    # GVP-style vector features: 16 nodes, 8 vector channels, 3 components.
    N, V, D = 16, 8, 3
    x = jax.random.normal(data_key, (N, V, D), dtype=jnp.float32)
    drop_rate = 0.25

    # eval mode: identity
    y_eval = vdropout(x, drop_rate, drop_key, training=False)
    assert np.array_equal(np.asarray(y_eval), np.asarray(x))

    # training mode: run the kernel
    y = vdropout(x, drop_rate, drop_key, training=True)
    y = jax.block_until_ready(y)

    # sanity: each vector channel is either fully zeroed, or scaled by 1/(1-p)
    keep = 1.0 - drop_rate
    o = np.asarray(y).reshape(-1, D)
    xr = np.asarray(x).reshape(-1, D)
    row_zero = np.all(o == 0.0, axis=-1)
    row_kept = np.all(np.isclose(o, xr / keep, rtol=1e-5, atol=1e-5), axis=-1)
    assert np.all(row_zero | row_kept), "vector channels not dropped together"
    assert y.shape == x.shape and y.dtype == x.dtype

    print("KERNEL_OK")
</pallas_src>

<mosaic_0001>
module attributes {stable_mosaic.version = 11 : i64} {
  func.func @_vdropout_kernel(%arg0: i32, %arg1: memref<1x128xi32, #tpu.memory_space<vmem>>, %arg2: memref<3x128xf32, #tpu.memory_space<vmem>>, %arg3: memref<3x128xf32, #tpu.memory_space<vmem>>) attributes {dimension_semantics = [#tpu.dimension_semantics<parallel>], iteration_bounds = array<i64: 1>, scalar_prefetch = 0 : i64, scratch_operands = 0 : i64, tpu.core_type = #tpu.core_type<tc>, window_params = [{transform_indices = @transform_0, window_bounds = array<i64: 1, 128>}, {transform_indices = @transform_1, window_bounds = array<i64: 3, 128>}, {transform_indices = @transform_2, window_bounds = array<i64: 3, 128>}]} {
    %c0 = arith.constant 0 : index
    %c0_0 = arith.constant 0 : index
    %0 = vector.load %arg1[%c0, %c0_0] : memref<1x128xi32, #tpu.memory_space<vmem>>, vector<1x128xi32>
    %c-1073741824_i32 = arith.constant -1073741824 : i32
    %1 = vector.broadcast %c-1073741824_i32 : i32 to vector<1x128xi32>
    %2 = arith.cmpi ult, %0, %1 : vector<1x128xi32>
    %c0_1 = arith.constant 0 : index
    %c0_2 = arith.constant 0 : index
    %3 = vector.load %arg2[%c0_1, %c0_2] : memref<3x128xf32, #tpu.memory_space<vmem>>, vector<3x128xf32>
    %cst = arith.constant 1.33333337 : f32
    %4 = vector.broadcast %cst : f32 to vector<3x128xf32>
    %5 = arith.mulf %3, %4 : vector<3x128xf32>
    %cst_3 = arith.constant 0.000000e+00 : f32
    %6 = vector.broadcast %cst_3 : f32 to vector<3x128xf32>
    %7 = vector.shape_cast %2 : vector<1x128xi1> to vector<1x128xi1>
    %8 = vector.broadcast %7 : vector<1x128xi1> to vector<3x128xi1>
    %9 = arith.select %8, %5, %6 : vector<3x128xi1>, vector<3x128xf32>
    %c0_4 = arith.constant 0 : index
    %c0_5 = arith.constant 0 : index
    %10 = vector.load %arg3[%c0_4, %c0_5] : memref<3x128xf32, #tpu.memory_space<vmem>>, vector<3x128xf32>
    tpu.vector_store %arg3[%c0_4, %c0_5], %9 {strides = array<i32>} : memref<3x128xf32, #tpu.memory_space<vmem>>, vector<3x128xf32>,
    return
  }
  func.func @transform_0(%arg0: i32) -> (i32, i32) {
    %c0_i32 = arith.constant 0 : i32
    %c0_i32_0 = arith.constant 0 : i32
    return %c0_i32, %arg0 : i32, i32
  }
  func.func @transform_1(%arg0: i32) -> (i32, i32) {
    %c0_i32 = arith.constant 0 : i32
    %c0_i32_0 = arith.constant 0 : i32
    return %c0_i32, %arg0 : i32, i32
  }
  func.func @transform_2(%arg0: i32) -> (i32, i32) {
    %c0_i32 = arith.constant 0 : i32
    %c0_i32_0 = arith.constant 0 : i32
    return %c0_i32, %arg0 : i32, i32
  }
}

</mosaic_0001>

<bundles_post_ra>
// kernel: tpu_custom_call.1
= control target key start
LH: loop header
LB: loop body
LE: loop exit
PB: predicated region body
PF: predicated region fallthrough
CT: control target
= control target key end

     0   :  { %7 = vsyncpa [#allocation3], 0  ;;  %s162_s0 = inlined_call_operand.hbm [shape: u32[1,128], index: 0, kind: input, shape index: {}]   ;;  %s163_s1 = inlined_call_operand.hbm [shape: f32[3,128], index: 1, kind: input, shape index: {}]   ;;  %s164_s2 = inlined_call_operand.hbm [shape: f32[3,128], index: 2, kind: output, shape index: {}]  }
   0x1   :  { %8 = vsyncpa [#allocation6], 0 }
   0x2   :  { %9 = vsyncpa [#allocation4], 0  ;;  %s134_s9 = smov [#allocation2]   ;;  %s135_s11 = smov [#allocation5]  }
   0x3   :  { %s16_s10 = sshll.u32 %s134_s9, 4  ;;  %s26_s12 = sshll.u32 %s135_s11, 4  ;;  %s17_s10 = int_to_ptr.vmem [resolvable:$true] %s16_s10  ;;  %s27_s12 = int_to_ptr.vmem [resolvable:$true] %s26_s12 }
   0x4   :  { %s76_s13 = scalar_lea.vmem %s17_s10, 16  ;;  %s80_s14 = scalar_lea.vmem %s17_s10, 32 }
   0x5   :  { %p77_p0 = scmp.ne.s32.totalorder %s17_s10, %s76_s13  ;;  %p81_p1 = scmp.lt.s32.totalorder %s17_s10, %s17_s10 }
   0x6   :  { %p82_p2 = scmp.lt.s32.totalorder %s80_s14, %s76_s13 }
   0x8   :  { %p83_p3 = por %p82_p2, %p81_p1 }
   0xa   :  { %p84_p4 = pnand %p83_p3, %p77_p0 }
   0xc   :  { %87 = shalt.err (!%p84_p4)
}
   0xd   :  { %19 = dma.hbm_to_vmem [thread:$0]  %s162_s0, 16, %s17_s10, [#allocation3]  }
   0xe   :  { %s96_s17 = scalar_lea.vmem %s27_s12, 64  ;;  %p101_p6 = scmp.lt.s32.totalorder %s27_s12, %s27_s12 }
   0xf   :  { %p97_p5 = scmp.ne.s32.totalorder %s27_s12, %s96_s17  ;;  %p102_p7 = scmp.lt.s32.totalorder %s96_s17, %s96_s17 }
  0x11   :  { %p103_p8 = por %p102_p7, %p101_p6 }
  0x13   :  { %p104_p9 = pnand %p103_p8, %p97_p5 }
  0x15   :  { %107 = shalt.err (!%p104_p9)
}
  0x16   :  { %29 = dma.hbm_to_vmem [thread:$0]  %s163_s1, 64, %s27_s12, [#allocation6]  }
  0x17   :  { %128 = dma.done.wait [#allocation3], 16  }
  0x18   :  { %129 = vsyncadd [#allocation3], 4294967280 }
  0x19   :  { %130 = dma.done.wait [#allocation6], 64  }
  0x1a   :  { %131 = vsyncadd [#allocation6], 4294967232  ;;  %v41_v0 = vlaneseq  ;;  %v36_v3 = vld [vmem:[#allocation2] sm:$0x1]  ;;  %v38_v4 = vld [vmem:[#allocation5] sm:$0x7] }
  0x1b   :  { %vm37_vm0 = vcmp.lt.u32.totalorder %v36_v3, 3221225472  ;;  %v39_v5 = vmul.f32 1.3333334, %v38_v4  ;;  %v136_v6 = vmov 0   ;;  %s137_s0 = smov [#allocation7]  }
  0x1c   :  { %v42_v1 = vshrl.u32 %v41_v0, 7  ;;  %v40_v7 = vsel %vm37_vm0, 1, %v136_v6  ;;  %s54_s20 = sshll.u32 %s137_s0, 4  ;;  %s55_s20 = int_to_ptr.vmem [resolvable:$true] %s54_s20 }
  0x1d   :  { %s108_s1 = scalar_lea.vmem %s55_s20, 64  ;;  %p113_p11 = scmp.lt.s32.totalorder %s55_s20, %s55_s20 }
  0x1e   :  { %v43_v2 = vsub.s32 0, %v42_v1  ;;  %p109_p10 = scmp.ne.s32.totalorder %s55_s20, %s108_s1  ;;  %p114_p12 = scmp.lt.s32.totalorder %s108_s1, %s108_s1 }
  0x20   :  { %v44_v8 = vrot.slane %v40_v7, %v43_v2  ;;  %p115_p13 = por %p114_p12, %p113_p11 }
  0x22   :  { %vm45_vm1 = vcmp.eq.s32.totalorder %v44_v8, 1  ;;  %p116_p0 = pnand %p115_p13, %p109_p10 }
  0x23   :  { %v46_v9 = vsel %vm45_vm1, %v39_v5, 0.0 }
  0x24   :  { %47 = vst [vmem:[#allocation7] sm:$0x7] %v46_v9 }
  0x25   :  { %119 = shalt.err (!%p116_p0)
}
  0x26   :  { %57 = dma.vmem_to_hbm [thread:$0]  %s55_s20, 64, %s164_s2, [#allocation4]  }
  0x27   :  { %132 = dma.done.wait [#allocation4], 64  }
  0x28   :  { %133 = vsyncadd [#allocation4], 4294967232 }
  0x29   :  { %61 = vsyncpa [#allocation3], 1 }
  0x2a   :  { %62 = vsyncpa [#allocation6], 1 }
  0x2b   :  { %63 = vsyncpa [#allocation4], 1 }

</bundles_post_ra>
